<compile_context>
chip_gen: v7x
topology: tpu7x:2x2x1
jax: 0.10.0
libtpu: 0.0.40
codegen_flags: <defaults>
</compile_context>

<pallas_src>
import functools

import jax
import jax.numpy as jnp
from jax.experimental import pallas as pl
from jax.experimental.pallas import tpu as pltpu


def _spatial_attention_kernel(wvec_ref, x_ref, o_ref, *, C, HWp, W):
    # wvec_ref: (18, HWp) f32 -- border-masked per-tap conv weights
    #           (rows 0..8: avg-channel taps, rows 9..17: max-channel taps).
    # x_ref:    (nb, C*HWp)   -- channel-flattened, lane-dense input slab.
    # o_ref:    (nb, HWp)     -- lane-dense spatial-attention map.
    nb = x_ref.shape[0]

    # Channel mean (f32 accumulation) and channel max from static lane slices.
    x0 = x_ref[:, 0:HWp]
    avg = x0.astype(jnp.float32)
    mx = x0
    for c in range(1, C):
        xc = x_ref[:, c * HWp:(c + 1) * HWp]
        avg = avg + xc.astype(jnp.float32)
        mx = jnp.maximum(mx, xc)
    avg = avg * (1.0 / C)
    mx = mx.astype(jnp.float32)

    # 9-tap shifted multiply-accumulate.  Out-of-bounds (zero-padding) taps
    # are already zeroed inside wvec, so lane wraparound of roll is harmless.
    acc = jnp.zeros((nb, HWp), jnp.float32)
    for k in range(9):
        di, dj = k // 3 - 1, k % 3 - 1
        s = di * W + dj                       # flat source offset of this tap
        if s == 0:
            sa, sm = avg, mx
        else:
            shift = (-s) % HWp                # jnp.roll semantics
            sa = pltpu.roll(avg, shift, axis=1)
            sm = pltpu.roll(mx, shift, axis=1)
        acc = acc + wvec_ref[k:k + 1, :] * sa + wvec_ref[9 + k:10 + k, :] * sm

    o_ref[...] = jax.nn.sigmoid(acc).astype(o_ref.dtype)


def _tensorcores_per_device():
    """Heuristic TensorCores per JAX device: 2 for v4/v5p/v7x, else 1."""
    try:
        kind = jax.devices()[0].device_kind.lower()
    except Exception:
        return 1
    if "v7" in kind or "v4" in kind:
        return 2
    if "v5" in kind and "lite" not in kind and "v5e" not in kind:
        return 2  # v5p megacore
    return 1


def _pick_batch_block(n, C, HWp, itemsize, num_cores):
    """Images per grid step: big HBM-saturating slabs that fit scoped VMEM."""
    # Per-image VMEM inside one step: double-buffered input + output blocks
    # plus ~8 f32 working maps (avg, max, acc, rolled copies, broadcasts).
    per_img = 2 * C * HWp * itemsize + 2 * HWp * itemsize + 8 * HWp * 4
    vmem_budget = (28 << 20) if num_cores > 1 else (56 << 20)
    target_x = (4 << 20) if num_cores > 1 else (8 << 20)
    nb = max(1, min(vmem_budget // per_img, target_x // (C * HWp * itemsize)))
    if num_cores > 1:
        # Keep >= num_cores grid steps so each TensorCore gets a share.
        nb = min(nb, max(1, pl.cdiv(n, num_cores)))
    return int(min(nb, n))


def spatial_attention(x, weight):
    """x: (N, C, H, W); weight: (1, 2, 3, 3) Conv2d(2,1,3,pad=1,no-bias) weight.

    Returns sigmoid(conv(cat([mean_C(x), max_C(x)]))) of shape (N, 1, H, W).
    """
    N, C, H, W = x.shape
    HW = H * W
    HWp = pl.cdiv(HW, 128) * 128          # lane-dense (multiple-of-128) width

    cores = _tensorcores_per_device()
    nb = _pick_batch_block(N, C, HWp, x.dtype.itemsize, cores)
    G = pl.cdiv(N, nb)
    Np = G * nb

    # Channel-flattened, lane-dense input layout: (G, nb, C*HWp).
    x3 = x.reshape(N, C, HW)
    if HWp != HW:
        x3 = jnp.pad(x3, ((0, 0), (0, 0), (0, HWp - HW)))
    if Np != N:
        x3 = jnp.pad(x3, ((0, Np - N), (0, 0), (0, 0)))
    x_flat = x3.reshape(G, nb, C * HWp)

    # Border-masked per-tap weight lane-vectors (18, HWp):
    # wvec[ch*9 + ki*3 + kj, p] = weight[0, ch, ki, kj] if the tap's source
    # pixel for output position p lies inside the image, else 0.
    w = weight.reshape(2, 3, 3).astype(jnp.float32)
    lane = jnp.arange(HWp, dtype=jnp.int32)
    h_idx, w_idx = lane // W, lane % W
    rows = []
    for ch in range(2):
        for ki in range(3):
            for kj in range(3):
                di, dj = ki - 1, kj - 1
                valid = ((h_idx + di >= 0) & (h_idx + di < H) &
                         (w_idx + dj >= 0) & (w_idx + dj < W) & (lane < HW))
                rows.append(jnp.where(valid, w[ch, ki, kj], 0.0))
    wvec = jnp.stack(rows, axis=0)                       # (18, HWp) f32

    # Scoped VMEM limit from the actual per-step footprint (respect v7x's
    # smaller 64 MiB-per-TC physical VMEM; raise above defaults on 1-TC).
    in_blk = nb * C * HWp * x.dtype.itemsize
    out_blk = nb * HWp * x.dtype.itemsize
    f32_map = nb * HWp * 4
    need = 2 * (in_blk + out_blk) + 8 * f32_map + 2 * 24 * HWp * 4 + (2 << 20)
    vmem_cap = (32 << 20) if cores > 1 else (64 << 20)
    vmem_limit = int(min(max(need, 32 << 20), vmem_cap))

    # TODO(synk): for very large H*W (a single image exceeding the VMEM
    # budget) add a second grid axis over H row-bands with a 1-row halo.
    kernel = functools.partial(_spatial_attention_kernel, C=C, HWp=HWp, W=W)
    out = pl.pallas_call(
        kernel,
        out_shape=jax.ShapeDtypeStruct((G, nb, HWp), x.dtype),
        grid=(G,),
        in_specs=[
            pl.BlockSpec((18, HWp), lambda g: (0, 0)),               # wvec
            pl.BlockSpec((None, nb, C * HWp), lambda g: (g, 0, 0)),  # x slab
        ],
        out_specs=pl.BlockSpec((None, nb, HWp), lambda g: (g, 0, 0)),
        compiler_params=pltpu.CompilerParams(
            dimension_semantics=("parallel",),
            vmem_limit_bytes=vmem_limit),
    )(wvec, x_flat)

    return out.reshape(Np, HWp)[:N, :HW].reshape(N, 1, H, W)


if __name__ == "__main__":
    key = jax.random.PRNGKey(0)
    kx, kw = jax.random.split(key)

    # Small shapes consistent with the module: N=2, C=4, H=W=16.
    x = jax.random.normal(kx, (2, 4, 16, 16), dtype=jnp.float32)

    # Deterministic Conv2d(2, 1, 3, padding=1, bias=False) weight init
    # (PyTorch-style uniform(-1/sqrt(fan_in), 1/sqrt(fan_in))).
    fan_in = 2 * 3 * 3
    bound = 1.0 / (fan_in ** 0.5)
    weight = jax.random.uniform(kw, (1, 2, 3, 3), jnp.float32, -bound, bound)

    out = spatial_attention(x, weight)
    out = jax.block_until_ready(out)

    # Pure-JAX reference for a correctness check.
    avg = jnp.mean(x, axis=1, keepdims=True)
    mx = jnp.max(x, axis=1, keepdims=True)
    cat = jnp.concatenate([avg, mx], axis=1)
    ref = jax.nn.sigmoid(
        jax.lax.conv_general_dilated(
            cat, weight, window_strides=(1, 1), padding="SAME",
            dimension_numbers=("NCHW", "OIHW", "NCHW"),
        )
    )
    assert out.shape == (2, 1, 16, 16)
    assert jnp.allclose(out, ref, atol=1e-5), float(jnp.max(jnp.abs(out - ref)))

    print("KERNEL_OK")
</pallas_src>

<mosaic_0001>
module attributes {stable_mosaic.version = 11 : i64} {
  func.func @_spatial_attention_kernel(%arg0: i32, %arg1: memref<18x256xf32, #tpu.memory_space<vmem>>, %arg2: memref<1x2x1024xf32, #tpu.memory_space<vmem>>, %arg3: memref<1x2x256xf32, #tpu.memory_space<vmem>>) attributes {dimension_semantics = [#tpu.dimension_semantics<parallel>], iteration_bounds = array<i64: 1>, scalar_prefetch = 0 : i64, scratch_operands = 0 : i64, tpu.core_type = #tpu.core_type<tc>, window_params = [{pipeline_mode = #tpu.pipeline_mode<synchronous>, transform_indices = @transform_0, window_bounds = array<i64: 18, 256>}, {transform_indices = @transform_1, window_bounds = array<i64: 1, 2, 1024>}, {transform_indices = @transform_2, window_bounds = array<i64: 1, 2, 256>}]} {
    %c0 = arith.constant 0 : index
    %c0_0 = arith.constant 0 : index
    %c0_1 = arith.constant 0 : index
    %0 = vector.load %arg2[%c0, %c0_0, %c0_1] : memref<1x2x1024xf32, #tpu.memory_space<vmem>>, vector<1x2x256xf32>
    %1 = vector.shape_cast %0 : vector<1x2x256xf32> to vector<2x256xf32>
    %c0_2 = arith.constant 0 : index
    %c0_3 = arith.constant 0 : index
    %c256 = arith.constant 256 : index
    %2 = vector.load %arg2[%c0_2, %c0_3, %c256] : memref<1x2x1024xf32, #tpu.memory_space<vmem>>, vector<1x2x256xf32>
    %3 = vector.shape_cast %2 : vector<1x2x256xf32> to vector<2x256xf32>
    %4 = arith.addf %1, %3 : vector<2x256xf32>
    %5 = arith.maximumf %1, %3 : vector<2x256xf32>
    %c0_4 = arith.constant 0 : index
    %c0_5 = arith.constant 0 : index
    %c512 = arith.constant 512 : index
    %6 = vector.load %arg2[%c0_4, %c0_5, %c512] : memref<1x2x1024xf32, #tpu.memory_space<vmem>>, vector<1x2x256xf32>
    %7 = vector.shape_cast %6 : vector<1x2x256xf32> to vector<2x256xf32>
    %8 = arith.addf %4, %7 : vector<2x256xf32>
    %9 = arith.maximumf %5, %7 : vector<2x256xf32>
    %c0_6 = arith.constant 0 : index
    %c0_7 = arith.constant 0 : index
    %c768 = arith.constant 768 : index
    %10 = vector.load %arg2[%c0_6, %c0_7, %c768] : memref<1x2x1024xf32, #tpu.memory_space<vmem>>, vector<1x2x256xf32>
    %11 = vector.shape_cast %10 : vector<1x2x256xf32> to vector<2x256xf32>
    %12 = arith.addf %8, %11 : vector<2x256xf32>
    %13 = arith.maximumf %9, %11 : vector<2x256xf32>
    %cst = arith.constant 2.500000e-01 : f32
    %14 = vector.broadcast %cst : f32 to vector<2x256xf32>
    %15 = arith.mulf %12, %14 : vector<2x256xf32>
    %cst_8 = arith.constant 0.000000e+00 : f32
    %16 = vector.broadcast %cst_8 : f32 to vector<2x256xf32>
    %c17_i32 = arith.constant 17 : i32
    %17 = tpu.dynamic_rotate %15 by %c17_i32 dim 1 : vector<2x256xf32>, i32 -> vector<2x256xf32>
    %c17_i32_9 = arith.constant 17 : i32
    %18 = tpu.dynamic_rotate %13 by %c17_i32_9 dim 1 : vector<2x256xf32>, i32 -> vector<2x256xf32>
    %c0_10 = arith.constant 0 : index
    %c0_11 = arith.constant 0 : index
    %19 = vector.load %arg1[%c0_10, %c0_11] : memref<18x256xf32, #tpu.memory_space<vmem>>, vector<1x256xf32>
    %20 = vector.broadcast %19 : vector<1x256xf32> to vector<2x256xf32>
    %21 = arith.mulf %20, %17 : vector<2x256xf32>
    %22 = arith.addf %16, %21 : vector<2x256xf32>
    %c9 = arith.constant 9 : index
    %c0_12 = arith.constant 0 : index
    %23 = vector.load %arg1[%c9, %c0_12] : memref<18x256xf32, #tpu.memory_space<vmem>>, vector<1x256xf32>
    %24 = vector.broadcast %23 : vector<1x256xf32> to vector<2x256xf32>
    %25 = arith.mulf %24, %18 : vector<2x256xf32>
    %26 = arith.addf %22, %25 : vector<2x256xf32>
    %c16_i32 = arith.constant 16 : i32
    %27 = tpu.dynamic_rotate %15 by %c16_i32 dim 1 : vector<2x256xf32>, i32 -> vector<2x256xf32>
    %c16_i32_13 = arith.constant 16 : i32
    %28 = tpu.dynamic_rotate %13 by %c16_i32_13 dim 1 : vector<2x256xf32>, i32 -> vector<2x256xf32>
    %c1 = arith.constant 1 : index
    %c0_14 = arith.constant 0 : index
    %29 = vector.load %arg1[%c1, %c0_14] : memref<18x256xf32, #tpu.memory_space<vmem>>, vector<1x256xf32>
    %30 = vector.broadcast %29 : vector<1x256xf32> to vector<2x256xf32>
    %31 = arith.mulf %30, %27 : vector<2x256xf32>
    %32 = arith.addf %26, %31 : vector<2x256xf32>
    %c10 = arith.constant 10 : index
    %c0_15 = arith.constant 0 : index
    %33 = vector.load %arg1[%c10, %c0_15] : memref<18x256xf32, #tpu.memory_space<vmem>>, vector<1x256xf32>
    %34 = vector.broadcast %33 : vector<1x256xf32> to vector<2x256xf32>
    %35 = arith.mulf %34, %28 : vector<2x256xf32>
    %36 = arith.addf %32, %35 : vector<2x256xf32>
    %c15_i32 = arith.constant 15 : i32
    %37 = tpu.dynamic_rotate %15 by %c15_i32 dim 1 : vector<2x256xf32>, i32 -> vector<2x256xf32>
    %c15_i32_16 = arith.constant 15 : i32
    %38 = tpu.dynamic_rotate %13 by %c15_i32_16 dim 1 : vector<2x256xf32>, i32 -> vector<2x256xf32>
    %c2 = arith.constant 2 : index
    %c0_17 = arith.constant 0 : index
    %39 = vector.load %arg1[%c2, %c0_17] : memref<18x256xf32, #tpu.memory_space<vmem>>, vector<1x256xf32>
    %40 = vector.broadcast %39 : vector<1x256xf32> to vector<2x256xf32>
    %41 = arith.mulf %40, %37 : vector<2x256xf32>
    %42 = arith.addf %36, %41 : vector<2x256xf32>
    %c11 = arith.constant 11 : index
    %c0_18 = arith.constant 0 : index
    %43 = vector.load %arg1[%c11, %c0_18] : memref<18x256xf32, #tpu.memory_space<vmem>>, vector<1x256xf32>
    %44 = vector.broadcast %43 : vector<1x256xf32> to vector<2x256xf32>
    %45 = arith.mulf %44, %38 : vector<2x256xf32>
    %46 = arith.addf %42, %45 : vector<2x256xf32>
    %c1_i32 = arith.constant 1 : i32
    %47 = tpu.dynamic_rotate %15 by %c1_i32 dim 1 : vector<2x256xf32>, i32 -> vector<2x256xf32>
    %c1_i32_19 = arith.constant 1 : i32
    %48 = tpu.dynamic_rotate %13 by %c1_i32_19 dim 1 : vector<2x256xf32>, i32 -> vector<2x256xf32>
    %c3 = arith.constant 3 : index
    %c0_20 = arith.constant 0 : index
    %49 = vector.load %arg1[%c3, %c0_20] : memref<18x256xf32, #tpu.memory_space<vmem>>, vector<1x256xf32>
    %50 = vector.broadcast %49 : vector<1x256xf32> to vector<2x256xf32>
    %51 = arith.mulf %50, %47 : vector<2x256xf32>
    %52 = arith.addf %46, %51 : vector<2x256xf32>
    %c12 = arith.constant 12 : index
    %c0_21 = arith.constant 0 : index
    %53 = vector.load %arg1[%c12, %c0_21] : memref<18x256xf32, #tpu.memory_space<vmem>>, vector<1x256xf32>
    %54 = vector.broadcast %53 : vector<1x256xf32> to vector<2x256xf32>
    %55 = arith.mulf %54, %48 : vector<2x256xf32>
    %56 = arith.addf %52, %55 : vector<2x256xf32>
    %c4 = arith.constant 4 : index
    %c0_22 = arith.constant 0 : index
    %57 = vector.load %arg1[%c4, %c0_22] : memref<18x256xf32, #tpu.memory_space<vmem>>, vector<1x256xf32>
    %58 = vector.broadcast %57 : vector<1x256xf32> to vector<2x256xf32>
    %59 = arith.mulf %58, %15 : vector<2x256xf32>
    %60 = arith.addf %56, %59 : vector<2x256xf32>
    %c13 = arith.constant 13 : index
    %c0_23 = arith.constant 0 : index
    %61 = vector.load %arg1[%c13, %c0_23] : memref<18x256xf32, #tpu.memory_space<vmem>>, vector<1x256xf32>
    %62 = vector.broadcast %61 : vector<1x256xf32> to vector<2x256xf32>
    %63 = arith.mulf %62, %13 : vector<2x256xf32>
    %64 = arith.addf %60, %63 : vector<2x256xf32>
    %c255_i32 = arith.constant 255 : i32
    %65 = tpu.dynamic_rotate %15 by %c255_i32 dim 1 : vector<2x256xf32>, i32 -> vector<2x256xf32>
    %c255_i32_24 = arith.constant 255 : i32
    %66 = tpu.dynamic_rotate %13 by %c255_i32_24 dim 1 : vector<2x256xf32>, i32 -> vector<2x256xf32>
    %c5 = arith.constant 5 : index
    %c0_25 = arith.constant 0 : index
    %67 = vector.load %arg1[%c5, %c0_25] : memref<18x256xf32, #tpu.memory_space<vmem>>, vector<1x256xf32>
    %68 = vector.broadcast %67 : vector<1x256xf32> to vector<2x256xf32>
    %69 = arith.mulf %68, %65 : vector<2x256xf32>
    %70 = arith.addf %64, %69 : vector<2x256xf32>
    %c14 = arith.constant 14 : index
    %c0_26 = arith.constant 0 : index
    %71 = vector.load %arg1[%c14, %c0_26] : memref<18x256xf32, #tpu.memory_space<vmem>>, vector<1x256xf32>
    %72 = vector.broadcast %71 : vector<1x256xf32> to vector<2x256xf32>
    %73 = arith.mulf %72, %66 : vector<2x256xf32>
    %74 = arith.addf %70, %73 : vector<2x256xf32>
    %c241_i32 = arith.constant 241 : i32
    %75 = tpu.dynamic_rotate %15 by %c241_i32 dim 1 : vector<2x256xf32>, i32 -> vector<2x256xf32>
    %c241_i32_27 = arith.constant 241 : i32
    %76 = tpu.dynamic_rotate %13 by %c241_i32_27 dim 1 : vector<2x256xf32>, i32 -> vector<2x256xf32>
    %c6 = arith.constant 6 : index
    %c0_28 = arith.constant 0 : index
    %77 = vector.load %arg1[%c6, %c0_28] : memref<18x256xf32, #tpu.memory_space<vmem>>, vector<1x256xf32>
    %78 = vector.broadcast %77 : vector<1x256xf32> to vector<2x256xf32>
    %79 = arith.mulf %78, %75 : vector<2x256xf32>
    %80 = arith.addf %74, %79 : vector<2x256xf32>
    %c15 = arith.constant 15 : index
    %c0_29 = arith.constant 0 : index
    %81 = vector.load %arg1[%c15, %c0_29] : memref<18x256xf32, #tpu.memory_space<vmem>>, vector<1x256xf32>
    %82 = vector.broadcast %81 : vector<1x256xf32> to vector<2x256xf32>
    %83 = arith.mulf %82, %76 : vector<2x256xf32>
    %84 = arith.addf %80, %83 : vector<2x256xf32>
    %c240_i32 = arith.constant 240 : i32
    %85 = tpu.dynamic_rotate %15 by %c240_i32 dim 1 : vector<2x256xf32>, i32 -> vector<2x256xf32>
    %c240_i32_30 = arith.constant 240 : i32
    %86 = tpu.dynamic_rotate %13 by %c240_i32_30 dim 1 : vector<2x256xf32>, i32 -> vector<2x256xf32>
    %c7 = arith.constant 7 : index
    %c0_31 = arith.constant 0 : index
    %87 = vector.load %arg1[%c7, %c0_31] : memref<18x256xf32, #tpu.memory_space<vmem>>, vector<1x256xf32>
    %88 = vector.broadcast %87 : vector<1x256xf32> to vector<2x256xf32>
    %89 = arith.mulf %88, %85 : vector<2x256xf32>
    %90 = arith.addf %84, %89 : vector<2x256xf32>
    %c16 = arith.constant 16 : index
    %c0_32 = arith.constant 0 : index
    %91 = vector.load %arg1[%c16, %c0_32] : memref<18x256xf32, #tpu.memory_space<vmem>>, vector<1x256xf32>
    %92 = vector.broadcast %91 : vector<1x256xf32> to vector<2x256xf32>
    %93 = arith.mulf %92, %86 : vector<2x256xf32>
    %94 = arith.addf %90, %93 : vector<2x256xf32>
    %c239_i32 = arith.constant 239 : i32
    %95 = tpu.dynamic_rotate %15 by %c239_i32 dim 1 : vector<2x256xf32>, i32 -> vector<2x256xf32>
    %c239_i32_33 = arith.constant 239 : i32
    %96 = tpu.dynamic_rotate %13 by %c239_i32_33 dim 1 : vector<2x256xf32>, i32 -> vector<2x256xf32>
    %c8 = arith.constant 8 : index
    %c0_34 = arith.constant 0 : index
    %97 = vector.load %arg1[%c8, %c0_34] : memref<18x256xf32, #tpu.memory_space<vmem>>, vector<1x256xf32>
    %98 = vector.broadcast %97 : vector<1x256xf32> to vector<2x256xf32>
    %99 = arith.mulf %98, %95 : vector<2x256xf32>
    %100 = arith.addf %94, %99 : vector<2x256xf32>
    %c17 = arith.constant 17 : index
    %c0_35 = arith.constant 0 : index
    %101 = vector.load %arg1[%c17, %c0_35] : memref<18x256xf32, #tpu.memory_space<vmem>>, vector<1x256xf32>
    %102 = vector.broadcast %101 : vector<1x256xf32> to vector<2x256xf32>
    %103 = arith.mulf %102, %96 : vector<2x256xf32>
    %104 = arith.addf %100, %103 : vector<2x256xf32>
    %105 = arith.negf %104 : vector<2x256xf32>
    %106 = math.exp %105 : vector<2x256xf32>
    %cst_36 = arith.constant 1.000000e+00 : f32
    %107 = vector.broadcast %cst_36 : f32 to vector<2x256xf32>
    %108 = arith.addf %107, %106 : vector<2x256xf32>
    %109 = arith.divf %107, %108 : vector<2x256xf32>
    %c0_37 = arith.constant 0 : index
    %c0_38 = arith.constant 0 : index
    %c0_39 = arith.constant 0 : index
    %110 = vector.load %arg3[%c0_37, %c0_38, %c0_39] : memref<1x2x256xf32, #tpu.memory_space<vmem>>, vector<1x2x256xf32>
    %111 = vector.shape_cast %110 : vector<1x2x256xf32> to vector<2x256xf32>
    %112 = vector.shape_cast %109 : vector<2x256xf32> to vector<1x2x256xf32>
    tpu.vector_store %arg3[%c0_37, %c0_38, %c0_39], %112 {strides = array<i32>} : memref<1x2x256xf32, #tpu.memory_space<vmem>>, vector<1x2x256xf32>,
    return
  }
  func.func @transform_0(%arg0: i32) -> (i32, i32) {
    %c0_i32 = arith.constant 0 : i32
    %c0_i32_0 = arith.constant 0 : i32
    %c0_i32_1 = arith.constant 0 : i32
    return %c0_i32, %c0_i32_0 : i32, i32
  }
  func.func @transform_1(%arg0: i32) -> (i32, i32, i32) {
    %c0_i32 = arith.constant 0 : i32
    %c0_i32_0 = arith.constant 0 : i32
    %c0_i32_1 = arith.constant 0 : i32
    return %arg0, %c0_i32, %c0_i32_0 : i32, i32, i32
  }
  func.func @transform_2(%arg0: i32) -> (i32, i32, i32) {
    %c0_i32 = arith.constant 0 : i32
    %c0_i32_0 = arith.constant 0 : i32
    %c0_i32_1 = arith.constant 0 : i32
    return %arg0, %c0_i32, %c0_i32_0 : i32, i32, i32
  }
}

</mosaic_0001>

<bundles_post_ra>
// kernel: tpu_custom_call.1
= control target key start
LH: loop header
LB: loop body
LE: loop exit
PB: predicated region body
PF: predicated region fallthrough
CT: control target
= control target key end

     0   :  { %7 = vsyncpa [#allocation3], 0  ;;  %s815_s0 = inlined_call_operand.hbm [shape: f32[18,256], index: 0, kind: input, shape index: {}]   ;;  %s816_s1 = inlined_call_operand.hbm [shape: f32[1,2,1024], index: 1, kind: input, shape index: {}]   ;;  %s817_s2 = inlined_call_operand.hbm [shape: f32[1,2,256], index: 2, kind: output, shape index: {}]  }
   0x1   :  { %8 = vsyncpa [#allocation6], 0 }
   0x2   :  { %9 = vsyncpa [#allocation4], 0  ;;  %s618_s9 = smov [#allocation2]   ;;  %s546_s13 = scalar_lea.hbm %s815_s0, 768 }
   0x3   :  { %s15_s10 = sshll.u32 %s618_s9, 4  ;;  %p547_p0 = scmp.ne.s32.totalorder %s815_s0, %s546_s13  ;;  %s16_s10 = int_to_ptr.vmem [resolvable:$true] %s15_s10 }
   0x4   :  { %p550_p1 = scmp.lt.u32.totalorder %s546_s13, %s815_s0 }
   0x6   :  { %p552_p2 = pnand %p550_p1, %p547_p0 }
   0x8   :  { %555 = shalt.err (!%p552_p2)
}
   0x9   :  { %s556_s18 = scalar_lea.vmem %s16_s10, 768  ;;  %p561_p4 = scmp.lt.s32.totalorder %s16_s10, %s16_s10 }
   0xa   :  { %p557_p3 = scmp.ne.s32.totalorder %s16_s10, %s556_s18  ;;  %p562_p5 = scmp.lt.s32.totalorder %s556_s18, %s556_s18 }
   0xc   :  { %p563_p6 = por %p562_p5, %p561_p4 }
   0xe   :  { %p564_p7 = pnand %p563_p6, %p557_p3 }
  0x10   :  { %567 = shalt.err (!%p564_p7)
}
  0x11   :  { %s619_s19 = smov 256   ;;  %s620_s20 = smov 16  }
  0x12   :  { %21 = dma.hbm_to_vmem [thread:$0]  %s815_s0, 768, %s16_s10, [#allocation3], %s619_s19, %s619_s19, %s620_s20  }
  0x13   :  { %s621_s23 = smov [#allocation5]   ;;  %s568_s27 = scalar_lea.hbm %s816_s1, 256 }
  0x14   :  { %s28_s24 = sshll.u32 %s621_s23, 4  ;;  %p569_p8 = scmp.ne.s32.totalorder %s816_s1, %s568_s27  ;;  %s29_s24 = int_to_ptr.vmem [resolvable:$true] %s28_s24 }
  0x15   :  { %p572_p9 = scmp.lt.u32.totalorder %s568_s27, %s816_s1 }
  0x17   :  { %p574_p10 = pnand %p572_p9, %p569_p8 }
  0x19   :  { %577 = shalt.err (!%p574_p10)
}
  0x1a   :  { %s578_s4 = scalar_lea.vmem %s29_s24, 256  ;;  %p583_p12 = scmp.lt.s32.totalorder %s29_s24, %s29_s24 }
  0x1b   :  { %p579_p11 = scmp.ne.s32.totalorder %s29_s24, %s578_s4  ;;  %p584_p13 = scmp.lt.s32.totalorder %s578_s4, %s578_s4 }
  0x1d   :  { %p585_p0 = por %p584_p13, %p583_p12 }
  0x1f   :  { %p586_p1 = pnand %p585_p0, %p579_p11 }
  0x21   :  { %589 = shalt.err (!%p586_p1)
}
  0x22   :  { %31 = dma.hbm_to_vmem [thread:$0]  %s816_s1, 256, %s29_s24, [#allocation6]  }
  0x23   :  { %612 = dma.done.wait [#allocation3], 768  }
  0x24   :  { %613 = vsyncadd [#allocation3], 4294966528 }
  0x25   :  { %614 = dma.done.wait [#allocation6], 256  }
  0x26   :  { %615 = vsyncadd [#allocation6], 4294967040  ;;  %v622_v0 = vmov 1983009808   ;;  %v53_v2 = vlaneseq  ;;  %v38_v5 = vld [vmem:[#allocation5] sm:$0xf] }
  0x27   :  { %v51_v1 = vunpack.c.l.s4 %v622_v0  ;;  %v39_v6 = vld [vmem:[#allocation5 + $0x4] sm:$0xf]  ;;  %v42_v7 = vld [vmem:[#allocation5 + $0x8] sm:$0xf]  ;;  %v45_v10 = vld [vmem:[#allocation5 + $0xc] sm:$0xf] }
  0x28   :  { %v54_v4 = vshrl.u32 %v53_v2, 7  ;;  %v41_v8 = vmax.f32 %v38_v5, %v39_v6  ;;  %v40_v9 = vadd.f32 %v39_v6, %v38_v5  ;;  %s623_s1 = smov 17   ;;  %s624_s6 = smov 15   ;;  %v261_v23 = vld [vmem:[#allocation2 + $0x4] ss:$8 sm:$0x3] }
  0x29   :  { %v52_v3 = vunpack.c.0.s8 %v51_v1  ;;  %v278_v26 = vld [vmem:[#allocation2 + $0x15] ss:$8 sm:$0x3]  ;;  %s625_s7 = smov 1   ;;  %s626_s8 = smov 127   ;;  %v693_v33 = vand.u32 127, %v53_v2 }
  0x2a   :  { %v44_v11 = vmax.f32 %v41_v8, %v42_v7  ;;  %v43_v13 = vadd.f32 %v42_v7, %v40_v9  ;;  %v676_v21 = vsub.s32 0, %v54_v4  ;;  %v678_v22 = vsub.s32 1, %v54_v4  ;;  %s627_s9 = smov 113   ;;  %s628_s10 = smov 112  }
  0x2b   :  { %v55_v12 = vsub.s32 %v52_v3, %v54_v4  ;;  %s629_s11 = smov 111   ;;  %v103_v34 = vld [vmem:[#allocation2 + $0x11] ss:$8 sm:$0x3]  ;;  %vm66_vm0 = vcmp.lt.s32.totalorder %v693_v33, 17  ;;  %vm123_vm1 = vcmp.lt.s32.totalorder %v693_v33, 16 }
  0x2c   :  { %v47_v14 = vmax.f32 %v44_v11, %v45_v10  ;;  %v46_v15 = vadd.f32 %v45_v10, %v43_v13  ;;  %v266_v24 = vrot.slane %v261_v23, %v676_v21  ;;  %v270_v25 = vrot.slane %v261_v23, %v678_v22  ;;  %v150_v39 = vld [vmem:[#allocation2 + $0x12] ss:$8 sm:$0x3]  ;;  %v197_v48 = vld [vmem:[#allocation2 + $0x13] ss:$8 sm:$0x3] }
  0x2d   :  { %v283_v29 = vrot.slane %v278_v26, %v676_v21  ;;  %v287_v30 = vrot.slane %v278_v26, %v678_v22  ;;  %v108_v37 = vrot.slane %v103_v34, %v676_v21  ;;  %v112_v38 = vrot.slane %v103_v34, %v678_v22  ;;  %v133_v57 = vld [vmem:[#allocation2 + $0x1] ss:$8 sm:$0x3]  ;;  %v180_v2 = vld [vmem:[#allocation2 + $0x2] ss:$8 sm:$0x3] }
  0x2e   :  { %v76_v16 = vrot.slane %v47_v14, %v55_v12  ;;  %v48_v18 = vmul.f32 0.25, %v46_v15  ;;  %v155_v46 = vrot.slane %v150_v39, %v676_v21  ;;  %v159_v47 = vrot.slane %v150_v39, %v678_v22  ;;  %v86_v3 = vld [vmem:[#allocation2] ss:$8 sm:$0x3]  ;;  %s630_s12 = smov [#allocation7]  }
  0x2f   :  { %vm170_vm2 = vcmp.lt.s32.totalorder %v693_v33, 15  ;;  %v202_v55 = vrot.slane %v197_v48, %v676_v21  ;;  %v206_v56 = vrot.slane %v197_v48, %v678_v22  ;;  %v138_v0 = vrot.slane %v133_v57, %v676_v21  ;;  %v227_v10 = vld [vmem:[#allocation2 + $0x3] ss:$8 sm:$0x3]  ;;  %s512_s13 = sshll.u32 %s630_s12, 4  ;;  %s513_s13 = int_to_ptr.vmem [resolvable:$true] %s512_s13 }
  0x30   :  { %126 = vrot.lane.b32.xlu0 %v76_v16, %s620_s20  ;;  %80 = vrot.lane.b32.xlu1 %v76_v16, %s623_s1  ;;  %v77_v17 = vcombine.high %v76_v16, %v76_v16  ;;  %v56_v19 = vrot.slane %v48_v18, %v55_v12  ;;  %v688_v31 = vmul.f32 %v283_v29, %v76_v16  ;;  %vm217_vm3 = vcmp.lt.s32.totalorder %v693_v33, 1  ;;  %v244_v34 = vld [vmem:[#allocation2 + $0x14] ss:$8 sm:$0x3]  ;;  %s590_s14 = scalar_lea.vmem %s513_s13, 64  ;;  %p595_p3 = scmp.lt.s32.totalorder %s513_s13, %s513_s13 }
  0x31   :  { %v142_v1 = vrot.slane %v133_v57, %v678_v22  ;;  %v185_v8 = vrot.slane %v180_v2, %v676_v21  ;;  %v189_v9 = vrot.slane %v180_v2, %v678_v22  ;;  %v91_v13 = vrot.slane %v86_v3, %v676_v21  ;;  %p591_p2 = scmp.ne.s32.totalorder %s513_s13, %s590_s14  ;;  %p596_p4 = scmp.lt.s32.totalorder %s590_s14, %s590_s14 }
  0x32   :  { %v57_v20 = vcombine.high %v56_v19, %v56_v19  ;;  %v682_v27 = vmul.f32 %v266_v24, %v56_v19  ;;  %v690_v32 = vmul.f32 %v287_v30, %v77_v17  ;;  %v95_v14 = vrot.slane %v86_v3, %v678_v22 }
  0x33   :  { %v236_v18 = vrot.slane %v227_v10, %v678_v22  ;;  %vm298_vm4 = vcmp.lt.s32.totalorder %v693_v33, 127  ;;  %vm345_vm5 = vcmp.lt.s32.totalorder %v693_v33, 113  ;;  %vm392_vm6 = vcmp.lt.s32.totalorder %v693_v33, 112  ;;  %p597_p5 = por %p596_p4, %p595_p3 }
  0x34   :  { %173 = vrot.lane.b32.xlu0 %v76_v16, %s624_s6  ;;  %82 = vrot.lane.b32.xlu1 %v77_v17, %s623_s1  ;;  %v684_v28 = vmul.f32 %v270_v25, %v57_v20  ;;  %vm439_vm7 = vcmp.lt.s32.totalorder %v693_v33, 111 }
  0x35   :  { %p598_p6 = pnand %p597_p5, %p591_p2 }
  0x38   :  { %128 = vrot.lane.b32.xlu1 %v77_v17, %s620_s20  ;;  %60 = vrot.lane.b32.xlu0 %v56_v19, %s623_s1 }
  0x3c   :  { %175 = vrot.lane.b32.xlu1 %v77_v17, %s624_s6  ;;  %119 = vrot.lane.b32.xlu0 %v56_v19, %s620_s20 }
  0x40   :  { %166 = vrot.lane.b32.xlu0 %v56_v19, %s624_s6  ;;  %121 = vrot.lane.b32.xlu1 %v57_v20, %s620_s20 }
  0x44   :  { %168 = vrot.lane.b32.xlu1 %v57_v20, %s624_s6  ;;  %62 = vrot.lane.b32.xlu0 %v57_v20, %s623_s1 }
  0x48   :  { %215 = vrot.lane.b32.xlu1 %v57_v20, %s625_s7  ;;  %213 = vrot.lane.b32.xlu0 %v56_v19, %s625_s7 }
  0x4c   :  { %222 = vrot.lane.b32.xlu1 %v77_v17, %s625_s7  ;;  %220 = vrot.lane.b32.xlu0 %v76_v16, %s625_s7 }
  0x50   :  { %296 = vrot.lane.b32.xlu1 %v57_v20, %s626_s8  ;;  %294 = vrot.lane.b32.xlu0 %v56_v19, %s626_s8 }
  0x54   :  { %303 = vrot.lane.b32.xlu1 %v77_v17, %s626_s8  ;;  %301 = vrot.lane.b32.xlu0 %v76_v16, %s626_s8 }
  0x58   :  { %343 = vrot.lane.b32.xlu1 %v57_v20, %s627_s9  ;;  %341 = vrot.lane.b32.xlu0 %v56_v19, %s627_s9 }
  0x5c   :  { %350 = vrot.lane.b32.xlu1 %v77_v17, %s627_s9  ;;  %348 = vrot.lane.b32.xlu0 %v76_v16, %s627_s9 }
  0x60   :  { %390 = vrot.lane.b32.xlu1 %v57_v20, %s628_s10  ;;  %388 = vrot.lane.b32.xlu0 %v56_v19, %s628_s10 }
  0x64   :  { %397 = vrot.lane.b32.xlu1 %v77_v17, %s628_s10  ;;  %395 = vrot.lane.b32.xlu0 %v76_v16, %s628_s10 }
  0x68   :  { %437 = vrot.lane.b32.xlu1 %v57_v20, %s629_s11  ;;  %435 = vrot.lane.b32.xlu0 %v56_v19, %s629_s11 }
  0x6c   :  { %444 = vrot.lane.b32.xlu1 %v77_v17, %s629_s11  ;;  %442 = vrot.lane.b32.xlu0 %v76_v16, %s629_s11  ;;  %v232_v17 = vrot.slane %v227_v10, %v676_v21 }
  0xa2   :  { %v127_v35 = vpop.permute.xlu0 %126  ;;  %v81_v36 = vpop.permute.xlu1 %80 }
  0xa6   :  { %v174_v40 = vpop.permute.xlu0 %173  ;;  %v83_v41 = vpop.permute.xlu1 %82 }
  0xa7   :  { %v84_v42 = vsel %vm66_vm0, %v81_v36, %v83_v41  ;;  %v85_v43 = vsel %vm66_vm0, %v83_v41, %v81_v36  ;;  %v249_v41 = vrot.slane %v244_v34, %v676_v21 }
  0xa8   :  { %v115_v44 = vmul.f32 %v108_v37, %v85_v43  ;;  %v116_v45 = vmul.f32 %v112_v38, %v84_v42  ;;  %v253_v42 = vrot.slane %v244_v34, %v678_v22 }
  0xaa   :  { %v129_v49 = vpop.permute.xlu1 %128  ;;  %v61_v50 = vpop.permute.xlu0 %60 }
  0xab   :  { %v130_v51 = vsel %vm123_vm1, %v127_v35, %v129_v49  ;;  %v131_v52 = vsel %vm123_vm1, %v129_v49, %v127_v35  ;;  %v308_v49 = vld [vmem:[#allocation2 + $0x5] ss:$8 sm:$0x3] }
  0xac   :  { %v162_v53 = vmul.f32 %v155_v46, %v131_v52  ;;  %v163_v54 = vmul.f32 %v159_v47, %v130_v51  ;;  %v317_v57 = vrot.slane %v308_v49, %v678_v22 }
  0xae   :  { %v176_v58 = vpop.permute.xlu1 %175  ;;  %v120_v59 = vpop.permute.xlu0 %119 }
  0xaf   :  { %v177_v60 = vsel %vm170_vm2, %v174_v40, %v176_v58  ;;  %v178_v61 = vsel %vm170_vm2, %v176_v58, %v174_v40 }
  0xb0   :  { %v209_v62 = vmul.f32 %v202_v55, %v178_v61  ;;  %v210_v63 = vmul.f32 %v206_v56, %v177_v60  ;;  %v313_v56 = vrot.slane %v308_v49, %v676_v21 }
  0xb2   :  { %v167_v4 = vpop.permute.xlu0 %166  ;;  %v122_v5 = vpop.permute.xlu1 %121 }
  0xb3   :  { %v124_v6 = vsel %vm123_vm1, %v120_v59, %v122_v5  ;;  %v125_v7 = vsel %vm123_vm1, %v122_v5, %v120_v59 }
  0xb4   :  { %v145_v11 = vmul.f32 %v138_v0, %v125_v7  ;;  %v146_v12 = vmul.f32 %v142_v1, %v124_v6 }
  0xb6   :  { %v169_v15 = vpop.permute.xlu1 %168  ;;  %v63_v16 = vpop.permute.xlu0 %62 }
  0xb7   :  { %v171_v19 = vsel %vm170_vm2, %v167_v4, %v169_v15  ;;  %v172_v20 = vsel %vm170_vm2, %v169_v15, %v167_v4  ;;  %v67_v23 = vsel %vm66_vm0, %v61_v50, %v63_v16  ;;  %v68_v24 = vsel %vm66_vm0, %v63_v16, %v61_v50 }
  0xb8   :  { %v192_v25 = vmul.f32 %v185_v8, %v172_v20  ;;  %v193_v26 = vmul.f32 %v189_v9, %v171_v19  ;;  %v98_v29 = vmul.f32 %v91_v13, %v68_v24  ;;  %v99_v30 = vmul.f32 %v95_v14, %v67_v23  ;;  %v372_v24 = vld [vmem:[#allocation2 + $0x17] ss:$8 sm:$0x3] }
  0xba   :  { %v117_v35 = vadd.f32 %v115_v44, %v98_v29  ;;  %v118_v36 = vadd.f32 %v116_v45, %v99_v30  ;;  %v216_v37 = vpop.permute.xlu1 %215  ;;  %v214_v38 = vpop.permute.xlu0 %213 }
  0xbb   :  { %v218_v39 = vsel %vm217_vm3, %v214_v38, %v216_v37  ;;  %v219_v40 = vsel %vm217_vm3, %v216_v37, %v214_v38 }
  0xbc   :  { %v147_v43 = vadd.f32 %v145_v11, %v117_v35  ;;  %v148_v46 = vadd.f32 %v146_v12, %v118_v36  ;;  %v239_v47 = vmul.f32 %v232_v17, %v219_v40  ;;  %v240_v48 = vmul.f32 %v236_v18, %v218_v39  ;;  %v355_v11 = vld [vmem:[#allocation2 + $0x6] ss:$8 sm:$0x3]  ;;  %v402_v40 = vld [vmem:[#allocation2 + $0x7] ss:$8 sm:$0x3] }
  0xbd   :  { %v360_v16 = vrot.slane %v355_v11, %v676_v21  ;;  %v364_v17 = vrot.slane %v355_v11, %v678_v22  ;;  %v377_v36 = vrot.slane %v372_v24, %v676_v21  ;;  %v466_v11 = vld [vmem:[#allocation2 + $0x21] ss:$8 sm:$0x3] }
  0xbe   :  { %v164_v50 = vadd.f32 %v162_v53, %v147_v43  ;;  %v165_v44 = vadd.f32 %v163_v54, %v148_v46  ;;  %v223_v45 = vpop.permute.xlu1 %222  ;;  %v221_v51 = vpop.permute.xlu0 %220  ;;  %v325_v53 = vld [vmem:[#allocation2 + $0x16] ss:$8 sm:$0x3] }
  0xbf   :  { %v224_v52 = vsel %vm217_vm3, %v221_v51, %v223_v45  ;;  %v225_v55 = vsel %vm217_vm3, %v223_v45, %v221_v51  ;;  %v330_v5 = vrot.slane %v325_v53, %v676_v21  ;;  %v334_v6 = vrot.slane %v325_v53, %v678_v22  ;;  %v419_v51 = vld [vmem:[#allocation2 + $0x20] ss:$8 sm:$0x3] }
  0xc0   :  { %v194_v58 = vadd.f32 %v192_v25, %v164_v50  ;;  %v195_v59 = vadd.f32 %v193_v26, %v165_v44  ;;  %v256_v60 = vmul.f32 %v249_v41, %v225_v55  ;;  %v257_v61 = vmul.f32 %v253_v42, %v224_v52 }
  0xc1   :  { %v424_v53 = vrot.slane %v419_v51, %v676_v21 }
  0xc2   :  { %v211_v54 = vadd.f32 %v209_v62, %v194_v58  ;;  %v212_v0 = vadd.f32 %v210_v63, %v195_v59  ;;  %v297_v1 = vpop.permute.xlu1 %296  ;;  %v295_v2 = vpop.permute.xlu0 %294 }
  0xc3   :  { %v299_v3 = vsel %vm298_vm4, %v295_v2, %v297_v1  ;;  %v300_v4 = vsel %vm298_vm4, %v297_v1, %v295_v2 }
  0xc4   :  { %v241_v7 = vadd.f32 %v239_v47, %v211_v54  ;;  %v242_v8 = vadd.f32 %v240_v48, %v212_v0  ;;  %v320_v9 = vmul.f32 %v313_v56, %v299_v3  ;;  %v321_v10 = vmul.f32 %v317_v57, %v300_v4  ;;  %v449_v0 = vld [vmem:[#allocation2 + $0x10] ss:$8 sm:$0x3] }
  0xc5   :  { %v407_v47 = vrot.slane %v402_v40, %v676_v21  ;;  %v411_v48 = vrot.slane %v402_v40, %v678_v22  ;;  %v428_v54 = vrot.slane %v419_v51, %v678_v22 }
  0xc6   :  { %v258_v12 = vadd.f32 %v256_v60, %v241_v7  ;;  %v259_v62 = vadd.f32 %v257_v61, %v242_v8  ;;  %v304_v63 = vpop.permute.xlu1 %303  ;;  %v302_v13 = vpop.permute.xlu0 %301 }
  0xc7   :  { %v305_v14 = vsel %vm298_vm4, %v302_v13, %v304_v63  ;;  %v306_v15 = vsel %vm298_vm4, %v304_v63, %v302_v13 }
  0xc8   :  { %v275_v18 = vadd.f32 %v682_v27, %v258_v12  ;;  %v276_v19 = vadd.f32 %v684_v28, %v259_v62  ;;  %v337_v20 = vmul.f32 %v330_v5, %v305_v14  ;;  %v338_v23 = vmul.f32 %v334_v6, %v306_v15 }
  0xc9   :  { %v381_v27 = vrot.slane %v372_v24, %v678_v22 }
  0xca   :  { %v292_v25 = vadd.f32 %v688_v31, %v275_v18  ;;  %v293_v26 = vadd.f32 %v690_v32, %v276_v19  ;;  %v344_v29 = vpop.permute.xlu1 %343  ;;  %v342_v30 = vpop.permute.xlu0 %341  ;;  %v471_v18 = vrot.slane %v466_v11, %v676_v21  ;;  %v475_v19 = vrot.slane %v466_v11, %v678_v22 }
  0xcb   :  { %v346_v34 = vsel %vm345_vm5, %v342_v30, %v344_v29  ;;  %v347_v35 = vsel %vm345_vm5, %v344_v29, %v342_v30 }
  0xcc   :  { %v322_v28 = vadd.f32 %v320_v9, %v292_v25  ;;  %v323_v37 = vadd.f32 %v321_v10, %v293_v26  ;;  %v367_v38 = vmul.f32 %v360_v16, %v346_v34  ;;  %v368_v39 = vmul.f32 %v364_v17, %v347_v35 }
  0xcd   :  { %v454_v9 = vrot.slane %v449_v0, %v676_v21  ;;  %v458_v10 = vrot.slane %v449_v0, %v678_v22 }
  0xce   :  { %v339_v31 = vadd.f32 %v337_v20, %v322_v28  ;;  %v340_v41 = vadd.f32 %v338_v23, %v323_v37  ;;  %v351_v32 = vpop.permute.xlu1 %350  ;;  %v349_v42 = vpop.permute.xlu0 %348 }
  0xcf   :  { %v352_v43 = vsel %vm345_vm5, %v349_v42, %v351_v32  ;;  %v353_v46 = vsel %vm345_vm5, %v351_v32, %v349_v42 }
  0xd0   :  { %v369_v49 = vadd.f32 %v367_v38, %v339_v31  ;;  %v370_v50 = vadd.f32 %v368_v39, %v340_v41  ;;  %v384_v44 = vmul.f32 %v377_v36, %v352_v43  ;;  %v385_v45 = vmul.f32 %v381_v27, %v353_v46 }
  0xd2   :  { %v386_v52 = vadd.f32 %v384_v44, %v369_v49  ;;  %v387_v55 = vadd.f32 %v385_v45, %v370_v50  ;;  %v391_v56 = vpop.permute.xlu1 %390  ;;  %v389_v57 = vpop.permute.xlu0 %388 }
  0xd3   :  { %v393_v58 = vsel %vm392_vm6, %v389_v57, %v391_v56  ;;  %v394_v59 = vsel %vm392_vm6, %v391_v56, %v389_v57 }
  0xd4   :  { %v414_v60 = vmul.f32 %v407_v47, %v393_v58  ;;  %v415_v61 = vmul.f32 %v411_v48, %v394_v59 }
  0xd6   :  { %v416_v1 = vadd.f32 %v414_v60, %v386_v52  ;;  %v417_v2 = vadd.f32 %v415_v61, %v387_v55  ;;  %v398_v3 = vpop.permute.xlu1 %397  ;;  %v396_v4 = vpop.permute.xlu0 %395 }
  0xd7   :  { %v399_v5 = vsel %vm392_vm6, %v396_v4, %v398_v3  ;;  %v400_v6 = vsel %vm392_vm6, %v398_v3, %v396_v4 }
  0xd8   :  { %v431_v7 = vmul.f32 %v424_v53, %v399_v5  ;;  %v432_v8 = vmul.f32 %v428_v54, %v400_v6 }
  0xda   :  { %v433_v12 = vadd.f32 %v431_v7, %v416_v1  ;;  %v434_v62 = vadd.f32 %v432_v8, %v417_v2  ;;  %v438_v63 = vpop.permute.xlu1 %437  ;;  %v436_v13 = vpop.permute.xlu0 %435 }
  0xdb   :  { %v440_v14 = vsel %vm439_vm7, %v436_v13, %v438_v63  ;;  %v441_v15 = vsel %vm439_vm7, %v438_v63, %v436_v13 }
  0xdc   :  { %v461_v16 = vmul.f32 %v454_v9, %v440_v14  ;;  %v462_v17 = vmul.f32 %v458_v10, %v441_v15 }
  0xde   :  { %v463_v20 = vadd.f32 %v461_v16, %v433_v12  ;;  %v464_v23 = vadd.f32 %v462_v17, %v434_v62  ;;  %v445_v24 = vpop.permute.xlu1 %444  ;;  %v443_v25 = vpop.permute.xlu0 %442 }
  0xdf   :  { %v446_v26 = vsel %vm439_vm7, %v443_v25, %v445_v24  ;;  %v447_v29 = vsel %vm439_vm7, %v445_v24, %v443_v25 }
  0xe0   :  { %v478_v30 = vmul.f32 %v471_v18, %v446_v26  ;;  %v479_v34 = vmul.f32 %v475_v19, %v447_v29 }
  0xe2   :  { %v480_v35 = vadd.f32 %v478_v30, %v463_v20  ;;  %v481_v36 = vadd.f32 %v479_v34, %v464_v23 }
  0xe4   :  { %v522_v27 = vmul.f32 -1.442695, %v480_v35  ;;  %v523_v28 = vmul.f32 -1.442695, %v481_v36 }
  0xe6   :  { %538 = vpow2.f32 %v522_v27 }
  0xe7   :  { %540 = vpow2.f32 %v523_v28 }
  0xf0   :  { %v539_v21 = vpop.eup %538 }
  0xf1   :  { %v541_v22 = vpop.eup %540  ;;  %v488_v37 = vadd.f32 1.0, %v539_v21 }
  0xf2   :  { %v489_v38 = vadd.f32 1.0, %v541_v22 }
  0xf3   :  { %542 = vrcp.f32 %v488_v37 }
  0xf4   :  { %544 = vrcp.f32 %v489_v38 }
  0xfd   :  { %v543_v39 = vpop.eup %542 }
  0xfe   :  { %v545_v40 = vpop.eup %544 }
  0xff   :  { %v496_v33 = vcombine.low %v543_v39, %v545_v40 }
 0x101   :  { %524 = vst.sshfl [vmem:[#allocation7] sm:$0x33 pattern:$0x76325410] %v496_v33 }
 0x102   :  { %601 = shalt.err (!%p598_p6)
}
 0x103   :  { %s602_s17 = scalar_lea.hbm %s817_s2, 64 }
 0x104   :  { %p603_p7 = scmp.ne.s32.totalorder %s817_s2, %s602_s17  ;;  %p606_p8 = scmp.lt.u32.totalorder %s602_s17, %s817_s2 }
 0x106   :  { %p608_p9 = pnand %p606_p8, %p603_p7 }
 0x108   :  { %611 = shalt.err (!%p608_p9)
}
 0x109   :  { %515 = dma.vmem_to_hbm [thread:$0]  %s513_s13, 64, %s817_s2, [#allocation4]  }
 0x10a   :  { %616 = dma.done.wait [#allocation4], 64  }
 0x10b   :  { %617 = vsyncadd [#allocation4], 4294967232 }
 0x10c   :  { %519 = vsyncpa [#allocation3], 1 }
 0x10d   :  { %520 = vsyncpa [#allocation6], 1 }
 0x10e   :  { %521 = vsyncpa [#allocation4], 1 }

</bundles_post_ra>
